<compile_context>
chip_gen: v5e
topology: v5e:2x2
jax: 0.10.0
libtpu: 0.0.40
codegen_flags: <defaults>
</compile_context>

<pallas_src>
import jax
import jax.numpy as jnp
from jax import lax
from jax.experimental import pallas as pl
from jax.experimental.pallas import tpu as pltpu

INPUT_SIZE = 20
HIDDEN_SIZE = 50
OUTPUT_SIZE = 2
MAX_TILE = 2048     # max batch rows per grid step (multiple of 128)


def mlp_kernel(x_ref, w1_ref, b1_ref, w2t_ref, b2t_ref, ot_ref):
    # x_ref:   [TB, INPUT_SIZE]       w1_ref:  [INPUT_SIZE, HIDDEN_SIZE]
    # b1_ref:  [1, HIDDEN_SIZE]       w2t_ref: [OUTPUT_SIZE, HIDDEN_SIZE]
    # b2t_ref: [OUTPUT_SIZE, 1]       ot_ref:  [OUTPUT_SIZE, TB]  (y transposed)
    x = x_ref[...]                                                     # f32
    h = jnp.dot(x, w1_ref[...], preferred_element_type=jnp.float32)   # [TB, H]
    h = jnp.maximum(h + b1_ref[...], 0.0)                             # ReLU
    # y^T = W2^T @ h^T, contracting the hidden dim of both operands
    # (same dot_general pattern as q @ k^T in flash attention).
    yt = lax.dot_general(
        w2t_ref[...], h,
        dimension_numbers=(((1,), (1,)), ((), ())),
        preferred_element_type=jnp.float32)                           # [OUT, TB]
    ot_ref[...] = (yt + b2t_ref[...]).astype(ot_ref.dtype)            # lane-dense store


def _tile_rows(batch):
    """Batch rows per grid step."""
    if batch <= 128:
        # One block == the full arrays (block dims equal to the array dims
        # bypass the (8,128) constraint); too little work to split across TCs.
        return batch
    # Aim for >=2 grid steps (v7x megacore) with tiles a multiple of 128 so
    # the transposed output block's lane dim stays aligned; cap per-step VMEM.
    half = pl.cdiv(batch, 2)
    return min(128 * pl.cdiv(half, 128), MAX_TILE)


def prepare_params(w1, b1, w2, b2):
    """One-time layout prep, hoisted out of the per-call forward.

    In  (math layout):  w1 [IN, H], b1 [H], w2 [H, OUT], b2 [OUT]
    Out (kernel layout): w1 [IN, H], b1 [1, H], w2^T [OUT, H], b2 [OUT, 1]
    """
    return (w1,
            b1.reshape(1, HIDDEN_SIZE),
            w2.T,
            b2.reshape(OUTPUT_SIZE, 1))


def simple_nn_forward(x, w1, b1_row, w2t, b2t_col):
    """x: [batch, INPUT_SIZE] f32; params already in kernel layout."""
    batch = x.shape[0]
    tb = _tile_rows(batch)
    grid = (pl.cdiv(batch, tb),)   # ragged last block masked by Pallas

    flops = 2 * batch * (INPUT_SIZE * HIDDEN_SIZE + HIDDEN_SIZE * OUTPUT_SIZE)
    bytes_accessed = 4 * (batch * (INPUT_SIZE + OUTPUT_SIZE)
                          + INPUT_SIZE * HIDDEN_SIZE + HIDDEN_SIZE
                          + OUTPUT_SIZE * HIDDEN_SIZE + OUTPUT_SIZE)

    out_t = pl.pallas_call(
        mlp_kernel,
        out_shape=jax.ShapeDtypeStruct((OUTPUT_SIZE, batch), jnp.float32),
        grid=grid,
        in_specs=[
            pl.BlockSpec((tb, INPUT_SIZE), lambda i: (i, 0)),            # x: tiled over batch
            pl.BlockSpec((INPUT_SIZE, HIDDEN_SIZE), lambda i: (0, 0)),   # W1: resident
            pl.BlockSpec((1, HIDDEN_SIZE), lambda i: (0, 0)),            # b1: resident
            pl.BlockSpec((OUTPUT_SIZE, HIDDEN_SIZE), lambda i: (0, 0)),  # W2^T: resident
            pl.BlockSpec((OUTPUT_SIZE, 1), lambda i: (0, 0)),            # b2 (col): resident
        ],
        out_specs=pl.BlockSpec((OUTPUT_SIZE, tb), lambda i: (0, i)),     # y^T, lane-dense
        compiler_params=pltpu.CompilerParams(
            dimension_semantics=("parallel",),   # shard batch tiles across TCs on v7x
        ),
        cost_estimate=pl.CostEstimate(
            flops=flops, transcendentals=0, bytes_accessed=bytes_accessed),
    )(x, w1, b1_row, w2t, b2t_col)

    # Tiny (8 B/row) transpose back to the module's [batch, OUTPUT_SIZE] layout.
    return out_t.T


def init_params(key):
    # Deterministic init mimicking nn.Linear's uniform(-1/sqrt(fan_in), 1/sqrt(fan_in)).
    k1, k2, k3, k4 = jax.random.split(key, 4)
    bound1 = 1.0 / jnp.sqrt(INPUT_SIZE)
    bound2 = 1.0 / jnp.sqrt(HIDDEN_SIZE)
    w1 = jax.random.uniform(k1, (INPUT_SIZE, HIDDEN_SIZE), jnp.float32, -bound1, bound1)
    b1 = jax.random.uniform(k2, (HIDDEN_SIZE,), jnp.float32, -bound1, bound1)
    w2 = jax.random.uniform(k3, (HIDDEN_SIZE, OUTPUT_SIZE), jnp.float32, -bound2, bound2)
    b2 = jax.random.uniform(k4, (OUTPUT_SIZE,), jnp.float32, -bound2, bound2)
    return w1, b1, w2, b2


def reference_forward(x, w1, b1, w2, b2):
    h = jnp.maximum(x @ w1 + b1, 0.0)
    return h @ w2 + b2


if __name__ == "__main__":
    key = jax.random.PRNGKey(0)
    kx, kp = jax.random.split(key)

    w1, b1, w2, b2 = init_params(kp)
    params = prepare_params(w1, b1, w2, b2)   # hoisted one-time weight prep

    # Small batch: single-block path.
    batch = 8
    x = jax.random.normal(kx, (batch, INPUT_SIZE), jnp.float32)
    out = jax.block_until_ready(simple_nn_forward(x, *params))
    ref = reference_forward(x, w1, b1, w2, b2)
    assert out.shape == (batch, OUTPUT_SIZE)
    assert jnp.allclose(out, ref, atol=1e-5, rtol=1e-5)

    # Larger batch: multi-step grid with a ragged (masked) last block.
    batch2 = 1000
    x2 = jax.random.normal(jax.random.PRNGKey(1), (batch2, INPUT_SIZE), jnp.float32)
    out2 = jax.block_until_ready(simple_nn_forward(x2, *params))
    ref2 = reference_forward(x2, w1, b1, w2, b2)
    assert out2.shape == (batch2, OUTPUT_SIZE)
    assert jnp.allclose(out2, ref2, atol=1e-4, rtol=1e-5)

    print("KERNEL_OK")
</pallas_src>

<mosaic_0001>
module attributes {stable_mosaic.version = 11 : i64} {
  func.func @mlp_kernel(%arg0: i32, %arg1: memref<8x20xf32, #tpu.memory_space<vmem>>, %arg2: memref<20x50xf32, #tpu.memory_space<vmem>>, %arg3: memref<1x50xf32, #tpu.memory_space<vmem>>, %arg4: memref<2x50xf32, #tpu.memory_space<vmem>>, %arg5: memref<2x1xf32, #tpu.memory_space<vmem>>, %arg6: memref<2x8xf32, #tpu.memory_space<vmem>>) attributes {dimension_semantics = [#tpu.dimension_semantics<parallel>], iteration_bounds = array<i64: 1>, scalar_prefetch = 0 : i64, scratch_operands = 0 : i64, tpu.core_type = #tpu.core_type<tc>, window_params = [{transform_indices = @transform_0, window_bounds = array<i64: 8, 20>}, {pipeline_mode = #tpu.pipeline_mode<synchronous>, transform_indices = @transform_1, window_bounds = array<i64: 20, 50>}, {pipeline_mode = #tpu.pipeline_mode<synchronous>, transform_indices = @transform_2, window_bounds = array<i64: 1, 50>}, {pipeline_mode = #tpu.pipeline_mode<synchronous>, transform_indices = @transform_3, window_bounds = array<i64: 2, 50>}, {pipeline_mode = #tpu.pipeline_mode<synchronous>, transform_indices = @transform_4, window_bounds = array<i64: 2, 1>}, {transform_indices = @transform_5, window_bounds = array<i64: 2, 8>}]} {
    %c0 = arith.constant 0 : index
    %c0_0 = arith.constant 0 : index
    %0 = vector.load %arg1[%c0, %c0_0] : memref<8x20xf32, #tpu.memory_space<vmem>>, vector<8x20xf32>
    %c0_1 = arith.constant 0 : index
    %c0_2 = arith.constant 0 : index
    %1 = vector.load %arg2[%c0_1, %c0_2] : memref<20x50xf32, #tpu.memory_space<vmem>>, vector<20x50xf32>
    %cst = arith.constant dense<0.000000e+00> : vector<8x50xf32>
    %2 = tpu.matmul %0, %1, %cst {dimension_numbers = #tpu.dot_dimension_numbers<[1], [0], [0], [1], [0, 0, 1, 1], [], []>} : vector<8x20xf32>, vector<20x50xf32>, vector<8x50xf32> -> vector<8x50xf32>
    %c0_3 = arith.constant 0 : index
    %c0_4 = arith.constant 0 : index
    %3 = vector.load %arg3[%c0_3, %c0_4] : memref<1x50xf32, #tpu.memory_space<vmem>>, vector<1x50xf32>
    %4 = vector.broadcast %3 : vector<1x50xf32> to vector<8x50xf32>
    %5 = arith.addf %2, %4 : vector<8x50xf32>
    %cst_5 = arith.constant 0.000000e+00 : f32
    %6 = vector.broadcast %cst_5 : f32 to vector<8x50xf32>
    %7 = arith.maximumf %5, %6 : vector<8x50xf32>
    %c0_6 = arith.constant 0 : index
    %c0_7 = arith.constant 0 : index
    %8 = vector.load %arg4[%c0_6, %c0_7] : memref<2x50xf32, #tpu.memory_space<vmem>>, vector<2x50xf32>
    %cst_8 = arith.constant dense<0.000000e+00> : vector<2x8xf32>
    %9 = tpu.matmul %8, %7, %cst_8 {dimension_numbers = #tpu.dot_dimension_numbers<[1], [1], [0], [0], [0, 0, 1, 0], [], []>} : vector<2x50xf32>, vector<8x50xf32>, vector<2x8xf32> -> vector<2x8xf32>
    %c0_9 = arith.constant 0 : index
    %c0_10 = arith.constant 0 : index
    %10 = vector.load %arg5[%c0_9, %c0_10] : memref<2x1xf32, #tpu.memory_space<vmem>>, vector<2x1xf32>
    %11 = vector.broadcast %10 : vector<2x1xf32> to vector<2x8xf32>
    %12 = arith.addf %9, %11 : vector<2x8xf32>
    %c0_11 = arith.constant 0 : index
    %c0_12 = arith.constant 0 : index
    %13 = vector.load %arg6[%c0_11, %c0_12] : memref<2x8xf32, #tpu.memory_space<vmem>>, vector<2x8xf32>
    tpu.vector_store %arg6[%c0_11, %c0_12], %12 {strides = array<i32>} : memref<2x8xf32, #tpu.memory_space<vmem>>, vector<2x8xf32>,
    return
  }
  func.func @transform_0(%arg0: i32) -> (i32, i32) {
    %c0_i32 = arith.constant 0 : i32
    %c0_i32_0 = arith.constant 0 : i32
    return %arg0, %c0_i32 : i32, i32
  }
  func.func @transform_1(%arg0: i32) -> (i32, i32) {
    %c0_i32 = arith.constant 0 : i32
    %c0_i32_0 = arith.constant 0 : i32
    %c0_i32_1 = arith.constant 0 : i32
    return %c0_i32, %c0_i32_0 : i32, i32
  }
  func.func @transform_2(%arg0: i32) -> (i32, i32) {
    %c0_i32 = arith.constant 0 : i32
    %c0_i32_0 = arith.constant 0 : i32
    %c0_i32_1 = arith.constant 0 : i32
    return %c0_i32, %c0_i32_0 : i32, i32
  }
  func.func @transform_3(%arg0: i32) -> (i32, i32) {
    %c0_i32 = arith.constant 0 : i32
    %c0_i32_0 = arith.constant 0 : i32
    %c0_i32_1 = arith.constant 0 : i32
    return %c0_i32, %c0_i32_0 : i32, i32
  }
  func.func @transform_4(%arg0: i32) -> (i32, i32) {
    %c0_i32 = arith.constant 0 : i32
    %c0_i32_0 = arith.constant 0 : i32
    %c0_i32_1 = arith.constant 0 : i32
    return %c0_i32, %c0_i32_0 : i32, i32
  }
  func.func @transform_5(%arg0: i32) -> (i32, i32) {
    %c0_i32 = arith.constant 0 : i32
    %c0_i32_0 = arith.constant 0 : i32
    return %c0_i32, %arg0 : i32, i32
  }
}

</mosaic_0001>

<bundles_post_ra>
// kernel: tpu_custom_call.1
= control target key start
LH: loop header
LB: loop body
LE: loop exit
PB: predicated region body
PF: predicated region fallthrough
CT: control target
= control target key end

     0   :  { %10 = vsyncpa [#allocation3], 0  ;;  %s286_s0 = inlined_call_operand.hbm [shape: f32[8,20], index: 0, kind: input, shape index: {}]   ;;  %s287_s1 = inlined_call_operand.hbm [shape: f32[20,50], index: 1, kind: input, shape index: {}]   ;;  %s288_s2 = inlined_call_operand.vmem [shape: f32[1,50], index: 2, kind: input, shape index: {}]   ;;  %s289_s3 = inlined_call_operand.vmem [shape: f32[2,50], index: 3, kind: input, shape index: {}]   ;;  %s290_s4 = inlined_call_operand.vmem [shape: f32[2,1], index: 4, kind: input, shape index: {}]   ;;  %s291_s5 = inlined_call_operand.hbm [shape: f32[2,8], index: 5, kind: output, shape index: {}]  }
   0x1   :  { %11 = vsyncpa [#allocation6], 0 }
   0x2   :  { %12 = vsyncpa [#allocation4], 0  ;;  %s18_s20 = sshll.u32 %s286_s0, 4  ;;  %s232_s21 = smov [#allocation2]   ;;  %s19_s20 = int_to_ptr.hbm [resolvable:$true] %s18_s20 }
   0x3   :  { %s20_s22 = sshll.u32 %s232_s21, 4  ;;  %s28_s25 = sshll.u32 %s287_s1, 4  ;;  %s21_s22 = int_to_ptr.vmem [resolvable:$true] %s20_s22  ;;  %s29_s25 = int_to_ptr.hbm [resolvable:$true] %s28_s25 }
   0x4   :  { %23 = dma.hbm_to_vmem [thread:$0]  %s19_s20, 128, %s21_s22, [#allocation3]  }
   0x5   :  { %s233_s26 = smov [#allocation5]   ;;  %s234_s28 = smov 128  }
   0x6   :  { %s30_s27 = sshll.u32 %s233_s26, 4  ;;  %s235_s29 = smov 8   ;;  %s31_s27 = int_to_ptr.vmem [resolvable:$true] %s30_s27 }
   0x7   :  { %36 = dma.hbm_to_vmem [thread:$0]  %s29_s25, 384, %s31_s27, [#allocation6], %s234_s28, %s234_s28, %s235_s29  }
   0x8   :  { %226 = dma.done.wait [#allocation3], 128  }
   0x9   :  { %227 = vsyncadd [#allocation3], 4294967168 }
   0xa   :  { %228 = dma.done.wait [#allocation6], 384  }
   0xb   :  { %229 = vsyncadd [#allocation6], 4294966912  ;;  %vm63_vm0 = vcmask 1043456   ;;  %v54_v0 = vld [vmem:[#allocation5 + $0x10] sm:$0xf]  ;;  %v53_v1 = vld [vmem:[#allocation5 + $0x8] sm:$0xff] }
   0xc   :  { %142 = vmatpush.msk.msra.mxu0 %vm63_vm0, %v54_v0  ;;  %v52_v2 = vld [vmem:[#allocation5] sm:$0xff]  ;;  %v51_v3 = vld [vmem:[#allocation2] sm:$0xff]  ;;  %vm59_vm1 = vcmask 162816   ;;  %v236_v5 = vmov 0   ;;  %vm95_vm2 = vcmask 408576   ;;  %s237_s9 = smov [#allocation7]  }
   0xd   :  { %v89_v4 = vld [vmem:[%s290_s4] sm:$0x3]  ;;  %152 = vset.pattern.permute.xlu0 %v236_v5  ;;  %s129_s4 = sshll.u32 %s237_s9, 4  ;;  %s131_s12 = sshll.u32 %s291_s5, 4  ;;  %vm122_vm3 = vcmask 58368   ;;  %s130_s4 = int_to_ptr.vmem [resolvable:$true] %s129_s4  ;;  %s132_s12 = int_to_ptr.hbm [resolvable:$true] %s131_s12 }
   0xe   :  { %81 = vmatpush.msra.mxu0 %v53_v1  ;;  %92 = vperm.xlu0 %152, %v89_v4   ;;  %v153_v6 = vld [vmem:[%s288_s2] ss:$0 sm:$0xff] }
   0xf   :  { %v88_v10 = vld [vmem:[%s289_s3] sm:$0x3] }
  0x10   :  { %82 = vmatpush.msra.mxu0 %v52_v2 }
  0x11   :  { %143 = vmatmul.msk.f32.vlgmr.msra.gmra.mxu0 %vm59_vm1, %v51_v3 }
  0x80   :  { %v93_v11 = vpop.permute.xlu0 %92 }
  0x8e   :  { %v84_v7 = vpop.f32.mrf.mxu0 }
  0x8f   :  { %v85_v8 = vadd.f32 %v153_v6, %v84_v7 }
  0x91   :  { %v87_v9 = vmax.f32 %v85_v8, 0.0 }
  0x93   :  { %144 = vmatpush.xpose.msk.msra.mxu1 %vm95_vm2, %v87_v9 }
  0x96   :  { %145 = vmatmul.msk.f32.vlgmr.msra.gmra.mxu1 %vm95_vm2, %v88_v10 }
 0x113   :  { %v119_v12 = vpop.f32.mrf.mxu1 }
 0x114   :  { %v120_v13 = vadd.f32 %v119_v12, %v93_v11 }
 0x116   :  { %123 = vst.msk [vmem:[#allocation7] sm:$0x3] %vm122_vm3, %v120_v13 }
 0x117   :  { %134 = dma.vmem_to_hbm [thread:$0]  %s130_s4, 32, %s132_s12, [#allocation4]  }
 0x118   :  { %230 = dma.done.wait [#allocation4], 32  }
 0x119   :  { %231 = vsyncadd [#allocation4], 4294967264 }
 0x11a   :  { %139 = vsyncpa [#allocation3], 1 }
 0x11b   :  { %140 = vsyncpa [#allocation6], 1 }
 0x11c   :  { %141 = vsyncpa [#allocation4], 1 }

</bundles_post_ra>
